<compile_context>
chip_gen: v6e
topology: v6e:2x2x1
jax: 0.10.0
libtpu: 0.0.40
codegen_flags: <defaults>
</compile_context>

<pallas_src>
import functools

import jax
import jax.numpy as jnp
from jax.experimental import pallas as pl
from jax.experimental.pallas import tpu as pltpu


# ----------------------------------------------------------------------------
# Small helpers
# ----------------------------------------------------------------------------
def _round_up(x, m):
    return ((x + m - 1) // m) * m


def _num_tensorcores():
    """Megacore row-splitting only pays off on chips with >1 TensorCore (v7x)."""
    try:
        kind = jax.devices()[0].device_kind.lower()
    except Exception:
        return 1
    return 2 if ("v7" in kind or "7x" in kind) else 1


def _pick_row_tile(mp, t_max, n_cores):
    """mp is a multiple of 128.  Single large tile on 1-TC chips; >= n_cores
    tiles on multi-TC chips.  Tiles stay multiples of 16 and divide mp."""
    t = mp
    while (t > t_max or mp // t < n_cores) and t % 32 == 0 and t > 16:
        t //= 2
    return t


def _pick_k_tile(kp, tk_max):
    """kp is a multiple of 128.  Largest 128-multiple divisor of kp <= tk_max."""
    if kp <= tk_max:
        return kp
    t = max((tk_max // 128) * 128, 128)
    while t > 128 and kp % t != 0:
        t -= 128
    return t


# ----------------------------------------------------------------------------
# Fused SAGEConv kernel:
#   out = relu?( concat[(A_cnt @ X_src) * inv_deg , X_dst] @ [Wl^T ; Wr^T] + b )
# Grid = (row tiles, K tiles over source nodes); K axis is a reduction
# ("arbitrary", last) accumulated into an f32 VMEM scratch.
# ----------------------------------------------------------------------------
def _sage_conv_kernel(a_ref, xsrc_ref, xdst_ref, inv_ref, wcat_ref, b_ref,
                      o_ref, acc_ref, *, relu):
    k = pl.program_id(1)

    @pl.when(k == 0)
    def _():
        acc_ref[...] = jnp.zeros_like(acc_ref)

    # bf16 operands (exact integer edge counts), f32 accumulation on the MXU.
    acc_ref[...] += jnp.dot(a_ref[...], xsrc_ref[...],
                            preferred_element_type=jnp.float32)

    @pl.when(k == pl.num_programs(1) - 1)
    def _():
        # Exact f32 mean normalization, then one 2*Hp-deep fused MXU matmul.
        agg = (acc_ref[...] * inv_ref[...]).astype(jnp.bfloat16)
        cat = jnp.concatenate([agg, xdst_ref[...]], axis=-1)     # (tm, 2*Hp)
        out = jnp.dot(cat, wcat_ref[...], preferred_element_type=jnp.float32)
        out += b_ref[...]
        if relu:
            out = jnp.maximum(out, 0.0)
        o_ref[...] = out.astype(o_ref.dtype)


def fused_sage_conv(a_cnt, inv_deg, x_src, x_dst, w_cat, bias, *, relu,
                    tm_max=512, tk_max=1024, n_cores=1,
                    out_dtype=jnp.bfloat16):
    """All operands are pre-padded by the caller:
       a_cnt:   [Mp, Kp] bf16 edge counts (dst x src), Mp/Kp multiples of 128
       inv_deg: [Mp, 1]  f32 per-destination 1/deg
       x_src:   [Kp, Hp] bf16,   x_dst: [Mp, Hp] bf16
       w_cat:   [2*Hp, Hp] bf16 = concat([Wl^T ; Wr^T])
       bias:    [1, Hp] f32
    Returns bf16 [Mp, Hp] (padded, feeds the next layer directly)."""
    Mp, Kp = a_cnt.shape
    Hp = x_src.shape[1]
    assert Mp % 128 == 0 and Kp % 128 == 0 and Hp % 128 == 0
    assert x_src.shape == (Kp, Hp) and x_dst.shape == (Mp, Hp)
    assert inv_deg.shape == (Mp, 1)
    assert w_cat.shape == (2 * Hp, Hp) and bias.shape == (1, Hp)

    tm = _pick_row_tile(Mp, tm_max, n_cores)
    tk = _pick_k_tile(Kp, tk_max)
    grid = (Mp // tm, Kp // tk)
    kernel = functools.partial(_sage_conv_kernel, relu=relu)

    return pl.pallas_call(
        kernel,
        out_shape=jax.ShapeDtypeStruct((Mp, Hp), out_dtype),
        grid_spec=pltpu.PrefetchScalarGridSpec(
            num_scalar_prefetch=0,
            grid=grid,
            in_specs=[
                pl.BlockSpec((tm, tk), lambda i, k: (i, k)),      # A counts tile
                pl.BlockSpec((tk, Hp), lambda i, k: (k, 0)),      # X_src K tile
                pl.BlockSpec((tm, Hp), lambda i, k: (i, 0)),      # X_dst row tile
                pl.BlockSpec((tm, 1), lambda i, k: (i, 0)),       # 1/deg (f32)
                pl.BlockSpec((2 * Hp, Hp), lambda i, k: (0, 0)),  # [Wl^T ; Wr^T]
                pl.BlockSpec((1, Hp), lambda i, k: (0, 0)),       # bias
            ],
            out_specs=pl.BlockSpec((tm, Hp), lambda i, k: (i, 0)),
            scratch_shapes=[pltpu.VMEM((tm, Hp), jnp.float32)],
        ),
        compiler_params=pltpu.CompilerParams(
            dimension_semantics=("parallel", "arbitrary"),
            vmem_limit_bytes=32 * 1024 * 1024,
        ),
    )(a_cnt, x_src, x_dst, inv_deg, w_cat, bias)


# ----------------------------------------------------------------------------
# Edge-wise dot product classifier:  pred[e] = sum_d u[e, d] * v[e, d]
# Lane-dense (te, 128) output block (row-sum broadcast over lanes) so stores
# are unmasked full-width vst; inputs are consumed in their native bf16.
# ----------------------------------------------------------------------------
def _edge_dot_kernel(u_ref, v_ref, o_ref):
    prod = u_ref[...].astype(jnp.float32) * v_ref[...].astype(jnp.float32)
    s = jnp.sum(prod, axis=-1, keepdims=True)          # (te, 1)
    o_ref[...] = jnp.broadcast_to(s, o_ref.shape)      # lane-dense store


def edge_dot(u, v, *, te_max=512, n_cores=1):
    E, Hp = u.shape
    assert v.shape == (E, Hp) and Hp % 128 == 0
    Ep = _round_up(E, 128)
    te = _pick_row_tile(Ep, te_max, n_cores)
    u_p = jnp.pad(u, ((0, Ep - E), (0, 0)))
    v_p = jnp.pad(v, ((0, Ep - E), (0, 0)))

    out = pl.pallas_call(
        _edge_dot_kernel,
        out_shape=jax.ShapeDtypeStruct((Ep, 128), jnp.float32),
        grid=(Ep // te,),
        in_specs=[pl.BlockSpec((te, Hp), lambda i: (i, 0)),
                  pl.BlockSpec((te, Hp), lambda i: (i, 0))],
        out_specs=pl.BlockSpec((te, 128), lambda i: (i, 0)),
        compiler_params=pltpu.CompilerParams(
            dimension_semantics=("parallel",),
            vmem_limit_bytes=32 * 1024 * 1024,
        ),
    )(u_p, v_p)
    return out[:E, 0]


# ----------------------------------------------------------------------------
# Glue: params, adjacency, weight packing, forward pass
# ----------------------------------------------------------------------------
def init_params(key, n_users, n_items, hidden):
    keys = jax.random.split(key, 6)

    def sage_params(k):
        k1, k2, k3 = jax.random.split(k, 3)
        bound = 1.0 / jnp.sqrt(jnp.float32(hidden))
        return {
            "W_l": jax.random.uniform(k1, (hidden, hidden), jnp.float32, -bound, bound),
            "b_l": jax.random.uniform(k2, (hidden,), jnp.float32, -bound, bound),
            "W_r": jax.random.uniform(k3, (hidden, hidden), jnp.float32, -bound, bound),
        }

    return {
        "user_emb": jax.random.normal(keys[0], (n_users, hidden), jnp.float32),
        "item_emb": jax.random.normal(keys[1], (n_items, hidden), jnp.float32),
        # to_hetero duplicates each SAGEConv per edge type.
        "conv1": {"user__select__item": sage_params(keys[2]),
                  "item__rev_select__user": sage_params(keys[3])},
        "conv2": {"user__select__item": sage_params(keys[4]),
                  "item__rev_select__user": sage_params(keys[5])},
    }


def _count_adjacency(rows, cols, n_rows_p, n_cols_p):
    """Padded dense edge-count adjacency [n_rows_p, n_cols_p] (dst x src) and
    the exact f32 per-row 1/deg mean scale."""
    counts = jnp.zeros((n_rows_p, n_cols_p), jnp.float32).at[rows, cols].add(1.0)
    deg = jnp.sum(counts, axis=1, keepdims=True)
    inv_deg = 1.0 / jnp.maximum(deg, 1.0)
    # Small integer counts are exact in bf16.
    return counts.astype(jnp.bfloat16), inv_deg


def _pack_weights(p, hidden, hp):
    """[Wl^T ; Wr^T] padded to (2*hp, hp) bf16 + padded f32 bias (1, hp)."""
    pad = hp - hidden
    wl_t = jnp.pad(p["W_l"].T, ((0, pad), (0, pad)))
    wr_t = jnp.pad(p["W_r"].T, ((0, pad), (0, pad)))
    w_cat = jnp.concatenate([wl_t, wr_t], axis=0).astype(jnp.bfloat16)
    b = jnp.pad(p["b_l"], (0, pad)).reshape(1, hp).astype(jnp.float32)
    return w_cat, b


def gnn_lp_forward(params, user_node_id, item_node_id, edge_index, edge_label_index):
    hidden = params["user_emb"].shape[1]
    hp = _round_up(hidden, 128)
    n_cores = _num_tensorcores()

    # Embedding lookup (XLA gather glue — node_id is typically arange).
    x_user = jnp.take(params["user_emb"], user_node_id, axis=0)
    x_item = jnp.take(params["item_emb"], item_node_id, axis=0)
    n_user, n_item = x_user.shape[0], x_item.shape[0]
    mu, mi = _round_up(n_user, 128), _round_up(n_item, 128)

    # Pad rows to 128 and features to 128 lanes ONCE, cast to bf16 ONCE; the
    # padded bf16 layout is carried through both conv layers unchanged.
    xu = jnp.pad(x_user, ((0, mu - n_user), (0, hp - hidden))).astype(jnp.bfloat16)
    xi = jnp.pad(x_item, ((0, mi - n_item), (0, hp - hidden))).astype(jnp.bfloat16)

    # Dense edge-count adjacency + exact f32 1/deg scale for both directions.
    # TODO(synk): at real graph scale replace the dense A @ X aggregation with
    # a CSR scalar-prefetch gather-accumulate kernel (PrefetchScalarGridSpec
    # with row-pointer / column-index prefetch); dense is only for tiny M, K.
    src, dst = edge_index[0], edge_index[1]
    a_ui, inv_ui = _count_adjacency(dst, src, mi, mu)   # item <- user
    a_iu, inv_iu = _count_adjacency(src, dst, mu, mi)   # user <- item

    w1u, b1u = _pack_weights(params["conv1"]["item__rev_select__user"], hidden, hp)
    w1i, b1i = _pack_weights(params["conv1"]["user__select__item"], hidden, hp)
    w2u, b2u = _pack_weights(params["conv2"]["item__rev_select__user"], hidden, hp)
    w2i, b2i = _pack_weights(params["conv2"]["user__select__item"], hidden, hp)

    conv = functools.partial(fused_sage_conv, n_cores=n_cores)
    # conv1 (to_hetero) + per-node-type ReLU — bf16 padded outputs.
    xu1 = conv(a_iu, inv_iu, xi, xu, w1u, b1u, relu=True)
    xi1 = conv(a_ui, inv_ui, xu, xi, w1i, b1i, relu=True)
    # conv2 (no activation) — padded garbage rows never reach the classifier.
    xu2 = conv(a_iu, inv_iu, xi1, xu1, w2u, b2u, relu=False)
    xi2 = conv(a_ui, inv_ui, xu1, xi1, w2i, b2i, relu=False)

    # Classifier: endpoint gather (XLA glue) + lane-dense Pallas mul/row-reduce.
    eu = jnp.take(xu2, edge_label_index[0], axis=0)
    ei = jnp.take(xi2, edge_label_index[1], axis=0)
    return edge_dot(eu, ei, n_cores=n_cores)


# Pure-JAX f32 reference (same math, no padding / no bf16) for a sanity check.
def gnn_lp_reference(params, user_node_id, item_node_id, edge_index, edge_label_index):
    x_user = params["user_emb"][user_node_id]
    x_item = params["item_emb"][item_node_id]
    n_user, n_item = x_user.shape[0], x_item.shape[0]
    src, dst = edge_index[0], edge_index[1]

    def mean_adj(rows, cols, nr, nc):
        a = jnp.zeros((nr, nc), jnp.float32).at[rows, cols].add(1.0)
        return a / jnp.maximum(jnp.sum(a, axis=1, keepdims=True), 1.0)

    a_ui = mean_adj(dst, src, n_item, n_user)
    a_iu = mean_adj(src, dst, n_user, n_item)

    def sage(a, xs, xd, p):
        return (a @ xs) @ p["W_l"].T + p["b_l"] + xd @ p["W_r"].T

    xu1 = jax.nn.relu(sage(a_iu, x_item, x_user, params["conv1"]["item__rev_select__user"]))
    xi1 = jax.nn.relu(sage(a_ui, x_user, x_item, params["conv1"]["user__select__item"]))
    xu2 = sage(a_iu, xi1, xu1, params["conv2"]["item__rev_select__user"])
    xi2 = sage(a_ui, xu1, xi1, params["conv2"]["user__select__item"])
    return jnp.sum(xu2[edge_label_index[0]] * xi2[edge_label_index[1]], axis=-1)


# ----------------------------------------------------------------------------
# Example run
# ----------------------------------------------------------------------------
if __name__ == "__main__":
    N_USERS, N_ITEMS, HIDDEN = 96, 160, 64
    N_EDGES, N_LABEL_EDGES = 400, 256

    key = jax.random.PRNGKey(0)
    k_params, k_e1, k_e2, k_l1, k_l2 = jax.random.split(key, 5)

    params = init_params(k_params, N_USERS, N_ITEMS, HIDDEN)
    user_node_id = jnp.arange(N_USERS, dtype=jnp.int32)
    item_node_id = jnp.arange(N_ITEMS, dtype=jnp.int32)
    edge_index = jnp.stack([
        jax.random.randint(k_e1, (N_EDGES,), 0, N_USERS, dtype=jnp.int32),
        jax.random.randint(k_e2, (N_EDGES,), 0, N_ITEMS, dtype=jnp.int32)])
    edge_label_index = jnp.stack([
        jax.random.randint(k_l1, (N_LABEL_EDGES,), 0, N_USERS, dtype=jnp.int32),
        jax.random.randint(k_l2, (N_LABEL_EDGES,), 0, N_ITEMS, dtype=jnp.int32)])

    pred = gnn_lp_forward(params, user_node_id, item_node_id, edge_index, edge_label_index)
    pred = jax.block_until_ready(pred)

    assert pred.shape == (N_LABEL_EDGES,), pred.shape
    assert bool(jnp.all(jnp.isfinite(pred)))

    # Loose tolerance vs f32 reference (bf16 feature storage + bf16 MXU
    # operands; adjacency counts and 1/deg normalization are exact).
    ref = gnn_lp_reference(params, user_node_id, item_node_id, edge_index, edge_label_index)
    err = float(jnp.max(jnp.abs(pred - ref)))
    scale = float(jnp.max(jnp.abs(ref))) + 1e-6
    assert err <= 0.05 * scale + 0.5, (err, scale)

    print("KERNEL_OK")
</pallas_src>

<mosaic_0001>
module attributes {stable_mosaic.version = 11 : i64} {
  func.func @_sage_conv_kernel(%arg0: i32, %arg1: i32, %arg2: memref<128x256xbf16, #tpu.memory_space<vmem>>, %arg3: memref<256x128xbf16, #tpu.memory_space<vmem>>, %arg4: memref<128x128xbf16, #tpu.memory_space<vmem>>, %arg5: memref<128x1xf32, #tpu.memory_space<vmem>>, %arg6: memref<256x128xbf16, #tpu.memory_space<vmem>>, %arg7: memref<1x128xf32, #tpu.memory_space<vmem>>, %arg8: memref<128x128xbf16, #tpu.memory_space<vmem>>, %arg9: memref<128x128xf32, #tpu.memory_space<vmem>>) attributes {dimension_semantics = [#tpu.dimension_semantics<parallel>, #tpu.dimension_semantics<arbitrary>], iteration_bounds = array<i64: 1, 1>, scalar_prefetch = 0 : i64, scratch_operands = 1 : i64, tpu.core_type = #tpu.core_type<tc>, window_params = [{transform_indices = @transform_0, window_bounds = array<i64: 128, 256>}, {transform_indices = @transform_1, window_bounds = array<i64: 256, 128>}, {transform_indices = @transform_2, window_bounds = array<i64: 128, 128>}, {transform_indices = @transform_3, window_bounds = array<i64: 128, 1>}, {pipeline_mode = #tpu.pipeline_mode<synchronous>, transform_indices = @transform_4, window_bounds = array<i64: 256, 128>}, {pipeline_mode = #tpu.pipeline_mode<synchronous>, transform_indices = @transform_5, window_bounds = array<i64: 1, 128>}, {transform_indices = @transform_6, window_bounds = array<i64: 128, 128>}]} {
    %c0_i32 = arith.constant 0 : i32
    %0 = arith.cmpi eq, %arg1, %c0_i32 : i32
    %1 = arith.extui %0 : i1 to i32
    %c0_i32_0 = arith.constant 0 : i32
    %2 = arith.cmpi ne, %1, %c0_i32_0 : i32
    scf.if %2 {
      %cst_10 = arith.constant 0.000000e+00 : f32
      %12 = vector.broadcast %cst_10 : f32 to vector<128x128xf32>
      %c0_11 = arith.constant 0 : index
      %c0_12 = arith.constant 0 : index
      %13 = vector.load %arg9[%c0_11, %c0_12] : memref<128x128xf32, #tpu.memory_space<vmem>>, vector<128x128xf32>
      tpu.vector_store %arg9[%c0_11, %c0_12], %12 {strides = array<i32>} : memref<128x128xf32, #tpu.memory_space<vmem>>, vector<128x128xf32>,
    } else {
    }
    %c0 = arith.constant 0 : index
    %c0_1 = arith.constant 0 : index
    %3 = vector.load %arg9[%c0, %c0_1] : memref<128x128xf32, #tpu.memory_space<vmem>>, vector<128x128xf32>
    %c0_2 = arith.constant 0 : index
    %c0_3 = arith.constant 0 : index
    %4 = vector.load %arg2[%c0_2, %c0_3] : memref<128x256xbf16, #tpu.memory_space<vmem>>, vector<128x256xbf16>
    %c0_4 = arith.constant 0 : index
    %c0_5 = arith.constant 0 : index
    %5 = vector.load %arg3[%c0_4, %c0_5] : memref<256x128xbf16, #tpu.memory_space<vmem>>, vector<256x128xbf16>
    %cst = arith.constant dense<0.000000e+00> : vector<128x128xf32>
    %6 = tpu.matmul %4, %5, %cst {dimension_numbers = #tpu.dot_dimension_numbers<[1], [0], [0], [1], [0, 0, 1, 1], [], []>} : vector<128x256xbf16>, vector<256x128xbf16>, vector<128x128xf32> -> vector<128x128xf32>
    %7 = arith.addf %3, %6 : vector<128x128xf32>
    %c0_6 = arith.constant 0 : index
    %c0_7 = arith.constant 0 : index
    %8 = vector.load %arg9[%c0_6, %c0_7] : memref<128x128xf32, #tpu.memory_space<vmem>>, vector<128x128xf32>
    tpu.vector_store %arg9[%c0_6, %c0_7], %7 {strides = array<i32>} : memref<128x128xf32, #tpu.memory_space<vmem>>, vector<128x128xf32>,
    %c0_i32_8 = arith.constant 0 : i32
    %9 = arith.cmpi eq, %arg1, %c0_i32_8 : i32
    %10 = arith.extui %9 : i1 to i32
    %c0_i32_9 = arith.constant 0 : i32
    %11 = arith.cmpi ne, %10, %c0_i32_9 : i32
    scf.if %11 {
      %c0_10 = arith.constant 0 : index
      %c0_11 = arith.constant 0 : index
      %12 = vector.load %arg9[%c0_10, %c0_11] : memref<128x128xf32, #tpu.memory_space<vmem>>, vector<128x128xf32>
      %c0_12 = arith.constant 0 : index
      %c0_13 = arith.constant 0 : index
      %13 = vector.load %arg5[%c0_12, %c0_13] : memref<128x1xf32, #tpu.memory_space<vmem>>, vector<128x1xf32>
      %14 = vector.broadcast %13 : vector<128x1xf32> to vector<128x128xf32>
      %15 = arith.mulf %12, %14 : vector<128x128xf32>
      %16 = arith.truncf %15 : vector<128x128xf32> to vector<128x128xbf16>
      %c0_14 = arith.constant 0 : index
      %c0_15 = arith.constant 0 : index
      %17 = vector.load %arg4[%c0_14, %c0_15] : memref<128x128xbf16, #tpu.memory_space<vmem>>, vector<128x128xbf16>
      %18 = tpu.concatenate %16, %17 in 1 : vector<128x128xbf16>, vector<128x128xbf16> -> vector<128x256xbf16>
      %c0_16 = arith.constant 0 : index
      %c0_17 = arith.constant 0 : index
      %19 = vector.load %arg6[%c0_16, %c0_17] : memref<256x128xbf16, #tpu.memory_space<vmem>>, vector<256x128xbf16>
      %cst_18 = arith.constant dense<0.000000e+00> : vector<128x128xf32>
      %20 = tpu.matmul %18, %19, %cst_18 {dimension_numbers = #tpu.dot_dimension_numbers<[1], [0], [0], [1], [0, 0, 1, 1], [], []>} : vector<128x256xbf16>, vector<256x128xbf16>, vector<128x128xf32> -> vector<128x128xf32>
      %c0_19 = arith.constant 0 : index
      %c0_20 = arith.constant 0 : index
      %21 = vector.load %arg7[%c0_19, %c0_20] : memref<1x128xf32, #tpu.memory_space<vmem>>, vector<1x128xf32>
      %22 = vector.broadcast %21 : vector<1x128xf32> to vector<128x128xf32>
      %23 = arith.addf %20, %22 : vector<128x128xf32>
      %cst_21 = arith.constant 0.000000e+00 : f32
      %24 = vector.broadcast %cst_21 : f32 to vector<128x128xf32>
      %25 = arith.maximumf %23, %24 : vector<128x128xf32>
      %26 = arith.truncf %25 : vector<128x128xf32> to vector<128x128xbf16>
      %c0_22 = arith.constant 0 : index
      %c0_23 = arith.constant 0 : index
      %27 = vector.load %arg8[%c0_22, %c0_23] : memref<128x128xbf16, #tpu.memory_space<vmem>>, vector<128x128xbf16>
      tpu.vector_store %arg8[%c0_22, %c0_23], %26 {strides = array<i32>} : memref<128x128xbf16, #tpu.memory_space<vmem>>, vector<128x128xbf16>,
    } else {
    }
    return
  }
  func.func @transform_0(%arg0: i32, %arg1: i32) -> (i32, i32) {
    %c0_i32 = arith.constant 0 : i32
    return %arg0, %arg1 : i32, i32
  }
  func.func @transform_1(%arg0: i32, %arg1: i32) -> (i32, i32) {
    %c0_i32 = arith.constant 0 : i32
    %c0_i32_0 = arith.constant 0 : i32
    return %arg1, %c0_i32 : i32, i32
  }
  func.func @transform_2(%arg0: i32, %arg1: i32) -> (i32, i32) {
    %c0_i32 = arith.constant 0 : i32
    %c0_i32_0 = arith.constant 0 : i32
    return %arg0, %c0_i32 : i32, i32
  }
  func.func @transform_3(%arg0: i32, %arg1: i32) -> (i32, i32) {
    %c0_i32 = arith.constant 0 : i32
    %c0_i32_0 = arith.constant 0 : i32
    return %arg0, %c0_i32 : i32, i32
  }
  func.func @transform_4(%arg0: i32, %arg1: i32) -> (i32, i32) {
    %c0_i32 = arith.constant 0 : i32
    %c0_i32_0 = arith.constant 0 : i32
    %c0_i32_1 = arith.constant 0 : i32
    return %c0_i32, %c0_i32_0 : i32, i32
  }
  func.func @transform_5(%arg0: i32, %arg1: i32) -> (i32, i32) {
    %c0_i32 = arith.constant 0 : i32
    %c0_i32_0 = arith.constant 0 : i32
    %c0_i32_1 = arith.constant 0 : i32
    return %c0_i32, %c0_i32_0 : i32, i32
  }
  func.func @transform_6(%arg0: i32, %arg1: i32) -> (i32, i32) {
    %c0_i32 = arith.constant 0 : i32
    %c0_i32_0 = arith.constant 0 : i32
    return %arg0, %c0_i32 : i32, i32
  }
}

</mosaic_0001>

<bundles_post_ra>
// kernel: tpu_custom_call.1
= control target key start
LH: loop header
LB: loop body
LE: loop exit
PB: predicated region body
PF: predicated region fallthrough
CT: control target
= control target key end

     0   :  { %11 = vsyncpa [#allocation4], 0  ;;  %s1610_s0 = inlined_call_operand.vmem [shape: bf16[128,256], index: 0, kind: input, shape index: {}]   ;;  %s1611_s1 = inlined_call_operand.hbm [shape: bf16[256,128], index: 1, kind: input, shape index: {}]   ;;  %s1612_s2 = inlined_call_operand.hbm [shape: bf16[128,128], index: 2, kind: input, shape index: {}]   ;;  %s1613_s3 = inlined_call_operand.vmem [shape: f32[128,1], index: 3, kind: input, shape index: {}]   ;;  %s1614_s4 = inlined_call_operand.hbm [shape: bf16[256,128], index: 4, kind: input, shape index: {}]   ;;  %s1615_s5 = inlined_call_operand.vmem [shape: f32[1,128], index: 5, kind: input, shape index: {}]   ;;  %s1616_s6 = inlined_call_operand.hbm [shape: bf16[128,128], index: 6, kind: output, shape index: {}]  }
   0x1   :  { %12 = vsyncpa [#allocation7], 0 }
   0x2   :  { %13 = vsyncpa [#allocation5], 0  ;;  %s1427_s21 = smov [#allocation6]   ;;  %s1428_s23 = smov [#allocation3]  }
   0x3   :  { %s33_s22 = sshll.u32 %s1427_s21, 4  ;;  %s21_s24 = sshll.u32 %s1428_s23, 4  ;;  %s34_s22 = int_to_ptr.vmem [resolvable:$true] %s33_s22  ;;  %s22_s24 = int_to_ptr.vmem [resolvable:$true] %s21_s24 }
   0x4   :  { %s1349_s25 = scalar_lea.vmem %s34_s22, 1024  ;;  %p1354_p1 = scmp.lt.s32.totalorder %s34_s22, %s34_s22 }
   0x5   :  { %p1350_p0 = scmp.ne.s32.totalorder %s34_s22, %s1349_s25  ;;  %p1355_p2 = scmp.lt.s32.totalorder %s1349_s25, %s1349_s25 }
   0x7   :  { %p1356_p3 = por %p1355_p2, %p1354_p1 }
   0x9   :  { %p1357_p4 = pnand %p1356_p3, %p1350_p0 }
   0xb   :  { %1360 = shalt.err (!%p1357_p4)
}
   0xc   :  { %s1429_s26 = smov 64   ;;  %s1430_s27 = smov 4  }
   0xd   :  { %39 = dma.hbm_to_vmem [thread:$0]  %s1612_s2, 1024, %s34_s22, [#allocation7], %s1429_s26, %s1429_s26, %s1430_s27  }
   0xe   :  { %s1369_s30 = scalar_lea.vmem %s22_s24, 2048  ;;  %p1374_p6 = scmp.lt.s32.totalorder %s22_s24, %s22_s24 }
   0xf   :  { %p1370_p5 = scmp.ne.s32.totalorder %s22_s24, %s1369_s30  ;;  %p1375_p7 = scmp.lt.s32.totalorder %s1369_s30, %s1369_s30 }
  0x11   :  { %p1376_p8 = por %p1375_p7, %p1374_p6 }
  0x13   :  { %p1377_p9 = pnand %p1376_p8, %p1370_p5 }
  0x15   :  { %1380 = shalt.err (!%p1377_p9)
}
  0x16   :  { %27 = dma.hbm_to_vmem [thread:$0]  %s1611_s1, 2048, %s22_s24, [#allocation4], %s1429_s26, %s1429_s26, %s1430_s27  }
  0x17   :  { %s1431_s9 = smov [#allocation8]  }
  0x18   :  { %s47_s10 = sshll.u32 %s1431_s9, 4  ;;  %s48_s10 = int_to_ptr.vmem [resolvable:$true] %s47_s10 }
  0x19   :  { %s1389_s11 = scalar_lea.vmem %s48_s10, 2048  ;;  %p1394_p11 = scmp.lt.s32.totalorder %s48_s10, %s48_s10 }
  0x1a   :  { %p1390_p10 = scmp.ne.s32.totalorder %s48_s10, %s1389_s11  ;;  %p1395_p12 = scmp.lt.s32.totalorder %s1389_s11, %s1389_s11 }
  0x1c   :  { %p1396_p13 = por %p1395_p12, %p1394_p11 }
  0x1e   :  { %p1397_p0 = pnand %p1396_p13, %p1390_p10 }
  0x20   :  { %1400 = shalt.err (!%p1397_p0)
}
  0x21   :  { %53 = dma.hbm_to_vmem [thread:$0]  %s1614_s4, 2048, %s48_s10, [#allocation7], %s1429_s26, %s1429_s26, %s1430_s27  }
  0x22   :  { %1421 = dma.done.wait [#allocation4], 2048  }
  0x23   :  { %1422 = vsyncadd [#allocation4], 4294965248 }
  0x24   :  { %1423 = dma.done.wait [#allocation7], 3072  }
  0x25   :  { %1424 = vsyncadd [#allocation7], 4294964224  ;;  %v1432_v0 = vmov 0   ;;  %v1277_v1 = vld [vmem:[#allocation3 + $0x78] sm:$0xff]   ;;  %v1279_v3 = vld [vmem:[#allocation3 + $0x70] sm:$0xff]  }
  0x26   :  { %1275 = vset.pattern.permute.xlu0 %v1432_v0  ;;  %1276 = vset.pattern.permute.xlu1 %v1432_v0  ;;  %v1278_v2 = vld [vmem:[#allocation3 + $0x38] sm:$0xff]   ;;  %v1280_v4 = vld [vmem:[#allocation3 + $0x30] sm:$0xff]   ;;  %v1281_v5 = vld [vmem:[#allocation3 + $0x68] sm:$0xff]  }
  0x27   :  { %1140 = vmatprep.subr.bf16.mxu0 %v1277_v1  ;;  %v1282_v6 = vld [vmem:[#allocation3 + $0x28] sm:$0xff]   ;;  %v1283_v7 = vld [vmem:[#allocation3 + $0x60] sm:$0xff]   ;;  %v1285_v9 = vld [vmem:[#allocation3 + $0x58] sm:$0xff]  }
  0x28   :  { %1141 = vmatpush3.bf16.msra.mxu0 %v1278_v2  ;;  %v1284_v8 = vld [vmem:[#allocation3 + $0x20] sm:$0xff]   ;;  %v1286_v10 = vld [vmem:[#allocation3 + $0x18] sm:$0xff]   ;;  %v1287_v11 = vld [vmem:[#allocation3 + $0x50] sm:$0xff]  }
  0x29   :  { %1142 = vmatprep.subr.bf16.mxu0 %v1279_v3  ;;  %v1295_v12 = vld [vmem:[%s1610_s0 + $0x4] ss:$8 sps:$4 sm:$0xff]   ;;  %v1288_v13 = vld [vmem:[#allocation3 + $0x10] sm:$0xff]   ;;  %v477_v21 = vld [vmem:[%s1613_s3 + $0x18] sm:$0xff] }
  0x2a   :  { %358 = vmatprep.mubr.bf16.mxu0 %v1295_v12  ;;  %v1289_v14 = vld [vmem:[#allocation3 + $0x48] sm:$0xff]   ;;  %v1291_v16 = vld [vmem:[#allocation3 + $0x40] sm:$0xff]   ;;  %v476_v19 = vld [vmem:[%s1613_s3 + $0x10] sm:$0xff] }
  0x2b   :  { %v1290_v15 = vld [vmem:[#allocation3 + $0x8] sm:$0xff]   ;;  %v474_v17 = vld [vmem:[%s1613_s3] sm:$0xff]  ;;  %502 = vperm.xlu1 %1276, %v476_v19   ;;  %v1296_v24 = vld [vmem:[%s1610_s0 + $0x14] ss:$8 sps:$4 sm:$0xff]  }
  0x2c   :  { %1143 = vmatpush3.bf16.msra.mxu0 %v1280_v4  ;;  %492 = vperm.xlu0 %1275, %v474_v17   ;;  %v475_v18 = vld [vmem:[%s1613_s3 + $0x8] sm:$0xff]  ;;  %v1292_v20 = vld [vmem:[#allocation3] sm:$0xff]   ;;  %v480_v26 = vld [vmem:[%s1613_s3 + $0x30] sm:$0xff] }
  0x2d   :  { %1144 = vmatprep.subr.bf16.mxu0 %v1281_v5  ;;  %v1293_v22 = vld [vmem:[%s1610_s0] ss:$8 sps:$4 sm:$0xff]   ;;  %v1317_v27 = vld [vmem:[#allocation8 + $0x78] sm:$0xff]   ;;  %v1319_v29 = vld [vmem:[#allocation8 + $0x70] sm:$0xff]  }
  0x2e   :  { %v478_v23 = vld [vmem:[%s1613_s3 + $0x20] sm:$0xff]  ;;  %v479_v25 = vld [vmem:[%s1613_s3 + $0x28] sm:$0xff]  ;;  %v1318_v28 = vld [vmem:[#allocation8 + $0x38] sm:$0xff]   ;;  %1204 = vmatprep.subr.bf16.mxu1 %v1317_v27 }
  0x2f   :  { %507 = vperm.xlu1 %1276, %v477_v21   ;;  %v481_v30 = vld [vmem:[%s1613_s3 + $0x38] sm:$0xff]  ;;  %1205 = vmatpush3.bf16.msra.mxu1 %v1318_v28  ;;  %v1320_v32 = vld [vmem:[#allocation8 + $0x30] sm:$0xff]   ;;  %v1299_v33 = vld [vmem:[%s1610_s0 + $0x24] ss:$8 sps:$4 sm:$0xff]  }
  0x30   :  { %1145 = vmatpush3.bf16.msra.mxu0 %v1282_v6  ;;  %497 = vperm.xlu0 %1275, %v475_v18   ;;  %v1298_v31 = vld [vmem:[%s1610_s0 + $0x10] ss:$8 sps:$4 sm:$0xff]   ;;  %v1321_v34 = vld [vmem:[#allocation8 + $0x68] sm:$0xff]   ;;  %v482_v35 = vld [vmem:[%s1613_s3 + $0x40] sm:$0xff] }
  0x31   :  { %1146 = vmatprep.subr.bf16.mxu0 %v1283_v7  ;;  %1206 = vmatprep.subr.bf16.mxu1 %v1319_v29  ;;  %v483_v36 = vld [vmem:[%s1613_s3 + $0x48] sm:$0xff]  ;;  %v484_v37 = vld [vmem:[%s1613_s3 + $0x50] sm:$0xff]  ;;  %v1323_v39 = vld [vmem:[#allocation8 + $0x60] sm:$0xff]  }
  0x32   :  { %v1322_v38 = vld [vmem:[#allocation8 + $0x28] sm:$0xff]   ;;  %v485_v40 = vld [vmem:[%s1613_s3 + $0x58] sm:$0xff]  ;;  %v1324_v41 = vld [vmem:[#allocation8 + $0x20] sm:$0xff]  }
  0x33   :  { %517 = vperm.xlu1 %1276, %v479_v25   ;;  %1207 = vmatpush3.bf16.msra.mxu1 %v1320_v32  ;;  %v1325_v42 = vld [vmem:[#allocation8 + $0x58] sm:$0xff]   ;;  %v1301_v43 = vld [vmem:[%s1610_s0 + $0x20] ss:$8 sps:$4 sm:$0xff]   ;;  %v488_v48 = vld [vmem:[%s1613_s3 + $0x70] sm:$0xff] }
  0x34   :  { %1147 = vmatpush3.bf16.msra.mxu0 %v1284_v8  ;;  %512 = vperm.xlu0 %1275, %v478_v23   ;;  %v486_v44 = vld [vmem:[%s1613_s3 + $0x60] sm:$0xff]  ;;  %v1302_v45 = vld [vmem:[%s1610_s0 + $0x34] ss:$8 sps:$4 sm:$0xff]   ;;  %v487_v46 = vld [vmem:[%s1613_s3 + $0x68] sm:$0xff] }
  0x35   :  { %1148 = vmatprep.subr.bf16.mxu0 %v1285_v9  ;;  %1208 = vmatprep.subr.bf16.mxu1 %v1321_v34  ;;  %v1326_v47 = vld [vmem:[#allocation8 + $0x18] sm:$0xff]   ;;  %v1305_v51 = vld [vmem:[%s1610_s0 + $0x44] ss:$8 sps:$4 sm:$0xff]   ;;  %v1307_v52 = vld [vmem:[%s1610_s0 + $0x40] ss:$8 sps:$4 sm:$0xff]  }
  0x36   :  { %v489_v49 = vld [vmem:[%s1613_s3 + $0x78] sm:$0xff]  ;;  %v1311_v55 = vld [vmem:[%s1610_s0 + $0x64] ss:$8 sps:$4 sm:$0xff]   ;;  %v1313_v56 = vld [vmem:[%s1610_s0 + $0x60] ss:$8 sps:$4 sm:$0xff]  }
  0x37   :  { %527 = vperm.xlu1 %1276, %v481_v30   ;;  %1209 = vmatpush3.bf16.msra.mxu1 %v1322_v38  ;;  %v1304_v50 = vld [vmem:[%s1610_s0 + $0x30] ss:$8 sps:$4 sm:$0xff]   ;;  %v1308_v53 = vld [vmem:[%s1610_s0 + $0x54] ss:$8 sps:$4 sm:$0xff]   ;;  %v1329_v61 = vld [vmem:[#allocation8 + $0x48] sm:$0xff]  }
  0x38   :  { %1149 = vmatpush3.bf16.msra.mxu0 %v1286_v10  ;;  %522 = vperm.xlu0 %1275, %v480_v26   ;;  %v1310_v54 = vld [vmem:[%s1610_s0 + $0x50] ss:$8 sps:$4 sm:$0xff]   ;;  %v1314_v57 = vld [vmem:[%s1610_s0 + $0x74] ss:$8 sps:$4 sm:$0xff]   ;;  %v1330_v62 = vld [vmem:[#allocation8 + $0x8] sm:$0xff]  }
  0x39   :  { %1150 = vmatprep.subr.bf16.mxu0 %v1287_v11  ;;  %1210 = vmatprep.subr.bf16.mxu1 %v1323_v39  ;;  %v1316_v58 = vld [vmem:[%s1610_s0 + $0x70] ss:$8 sps:$4 sm:$0xff]   ;;  %v1331_v63 = vld [vmem:[#allocation8 + $0x40] sm:$0xff]  }
  0x3a   :  { %v1327_v59 = vld [vmem:[#allocation8 + $0x50] sm:$0xff]   ;;  %v1332_v0 = vld [vmem:[#allocation8] sm:$0xff]   ;;  %v1336_v38 = vld [vmem:[#allocation6 + $0x18] sm:$0xff]  }
  0x3b   :  { %537 = vperm.xlu1 %1276, %v483_v36   ;;  %1211 = vmatpush3.bf16.msra.mxu1 %v1324_v41  ;;  %v1328_v60 = vld [vmem:[#allocation8 + $0x10] sm:$0xff]   ;;  %v1333_v1 = vld [vmem:[#allocation6] sm:$0xff]  }
  0x3c   :  { %1151 = vmatpush3.bf16.msra.mxu0 %v1288_v13  ;;  %532 = vperm.xlu0 %1275, %v482_v35   ;;  %v1335_v26 = vld [vmem:[#allocation6 + $0x10] sm:$0xff]  }
  0x3d   :  { %1152 = vmatprep.subr.bf16.mxu0 %v1289_v14  ;;  %1212 = vmatprep.subr.bf16.mxu1 %v1325_v42 }
  0x3e   :  { %825 = vmatprep.mubr.bf16.mxu1 %v1333_v1 }
  0x3f   :  { %547 = vperm.xlu1 %1276, %v485_v40   ;;  %1213 = vmatpush3.bf16.msra.mxu1 %v1326_v47 }
  0x40   :  { %1153 = vmatpush3.bf16.msra.mxu0 %v1290_v15  ;;  %542 = vperm.xlu0 %1275, %v484_v37   ;;  %v1334_v15 = vld [vmem:[#allocation6 + $0x8] sm:$0xff]  }
  0x41   :  { %1154 = vmatprep.subr.bf16.mxu0 %v1291_v16  ;;  %1214 = vmatprep.subr.bf16.mxu1 %v1327_v59 }
  0x43   :  { %557 = vperm.xlu1 %1276, %v487_v46   ;;  %1215 = vmatpush3.bf16.msra.mxu1 %v1328_v60 }
  0x44   :  { %1155 = vmatpush3.bf16.msra.mxu0 %v1292_v20  ;;  %552 = vperm.xlu0 %1275, %v486_v44  }
  0x45   :  { %1216 = vmatprep.subr.bf16.mxu1 %v1329_v61 }
  0x47   :  { %359 = vmatmul.mubr.bf16.vlgmr.msra.gmra.mxu0 %v1293_v22  ;;  %567 = vperm.xlu1 %1276, %v489_v49  }
  0x48   :  { %366 = vmatprep.mubr.bf16.mxu0 %v1296_v24  ;;  %562 = vperm.xlu0 %1275, %v488_v48  }
  0x49   :  { %1217 = vmatpush3.bf16.msra.mxu1 %v1330_v62  ;;  %v1338_v62 = vld [vmem:[#allocation6 + $0x28] sm:$0xff]  }
  0x4a   :  { %1218 = vmatprep.subr.bf16.mxu1 %v1331_v63 }
  0x4d   :  { %1219 = vmatpush3.bf16.msra.mxu1 %v1332_v0 }
  0x4f   :  { %367 = vmatmul.mubr.bf16.gmra.mxu0 %v1298_v31 }
  0x50   :  { %374 = vmatprep.mubr.bf16.mxu0 %v1299_v33 }
  0x57   :  { %375 = vmatmul.mubr.bf16.gmra.mxu0 %v1301_v43 }
  0x58   :  { %382 = vmatprep.mubr.bf16.mxu0 %v1302_v45 }
  0x5f   :  { %383 = vmatmul.mubr.bf16.gmra.mxu0 %v1304_v50  ;;  %v1337_v50 = vld [vmem:[#allocation6 + $0x20] sm:$0xff]  }
  0x60   :  { %390 = vmatprep.mubr.bf16.mxu0 %v1305_v51 }
  0x67   :  { %391 = vmatmul.mubr.bf16.gmra.mxu0 %v1307_v52 }
  0x68   :  { %398 = vmatprep.mubr.bf16.mxu0 %v1308_v53 }
  0x6f   :  { %399 = vmatmul.mubr.bf16.gmra.mxu0 %v1310_v54 }
  0x70   :  { %406 = vmatprep.mubr.bf16.mxu0 %v1311_v55 }
  0x77   :  { %407 = vmatmul.mubr.bf16.gmra.mxu0 %v1313_v56 }
  0x78   :  { %414 = vmatprep.mubr.bf16.mxu0 %v1314_v57 }
  0x7f   :  { %415 = vmatmul.mubr.bf16.gmra.mxu0 %v1316_v58 }
  0xa6   :  { %v503_v13 = vpop.permute.xlu1 %502 }
  0xa7   :  { %v493_v3 = vpop.permute.xlu0 %492 }
  0xaa   :  { %v508_v21 = vpop.permute.xlu1 %507 }
  0xab   :  { %v498_v9 = vpop.permute.xlu0 %497 }
  0xae   :  { %v518_v33 = vpop.permute.xlu1 %517 }
  0xaf   :  { %v513_v31 = vpop.permute.xlu0 %512 }
  0xb2   :  { %v528_v45 = vpop.permute.xlu1 %527 }
  0xb3   :  { %v523_v43 = vpop.permute.xlu0 %522 }
  0xb6   :  { %v538_v57 = vpop.permute.xlu1 %537 }
  0xb7   :  { %v533_v55 = vpop.permute.xlu0 %532 }
 0x107   :  { %v1156_v2 = vpop.f32.mrf.mxu0 }
 0x109   :  { %v1157_v4 = vpop.f32.mrf.mxu0 }
 0x10a   :  { %v1158_v6 = vadd.f32 %v1157_v4, %v1156_v2 }
 0x10b   :  { %v1159_v5 = vpop.f32.mrf.mxu0 }
 0x10c   :  { %v570_v11 = vmul.f32 %v1158_v6, %v493_v3  ;;  %v543_v3 = vpop.permute.xlu0 %542 }
 0x10d   :  { %v1160_v7 = vpop.f32.mrf.mxu0 }
 0x10e   :  { %v1161_v8 = vadd.f32 %v1160_v7, %v1159_v5  ;;  %v548_v5 = vpop.permute.xlu1 %547 }
 0x10f   :  { %v1162_v10 = vpop.f32.mrf.mxu0 }
 0x110   :  { %v571_v12 = vmul.f32 %v1161_v8, %v498_v9 }
 0x111   :  { %v1163_v14 = vpop.f32.mrf.mxu0 }
 0x112   :  { %v586_v16 = vpack.c.bf16 %v571_v12, %v570_v11  ;;  %v1164_v18 = vadd.f32 %v1163_v14, %v1162_v10  ;;  %v1339_v10 = vld [vmem:[#allocation6 + $0x30] sm:$0xff]  }
 0x113   :  { %v1165_v17 = vpop.f32.mrf.mxu0 }
 0x114   :  { %826 = vmatmul.mubr.bf16.vlgmr.msra.gmra.mxu1 %v586_v16  ;;  %v572_v23 = vmul.f32 %v1164_v18, %v503_v13 }
 0x115   :  { %v1166_v19 = vpop.f32.mrf.mxu0  ;;  %833 = vmatprep.mubr.bf16.mxu1 %v1334_v15  ;;  %v553_v15 = vpop.permute.xlu0 %552 }
 0x116   :  { %v1167_v20 = vadd.f32 %v1166_v19, %v1165_v17  ;;  %v558_v17 = vpop.permute.xlu1 %557 }
 0x117   :  { %v1168_v22 = vpop.f32.mrf.mxu0 }
 0x118   :  { %v573_v24 = vmul.f32 %v1167_v20, %v508_v21 }
 0x119   :  { %v1169_v25 = vpop.f32.mrf.mxu0 }
 0x11a   :  { %v587_v27 = vpack.c.bf16 %v573_v24, %v572_v23  ;;  %v1170_v29 = vadd.f32 %v1169_v25, %v1168_v22  ;;  %v1340_v22 = vld [vmem:[#allocation6 + $0x38] sm:$0xff]  }
 0x11b   :  { %v1171_v28 = vpop.f32.mrf.mxu0 }
 0x11c   :  { %834 = vmatmul.mubr.bf16.gmra.mxu1 %v587_v27  ;;  %v574_v35 = vmul.f32 %v1170_v29, %v513_v31  ;;  %v568_v29 = vpop.permute.xlu1 %567 }
 0x11d   :  { %v1172_v30 = vpop.f32.mrf.mxu0  ;;  %841 = vmatprep.mubr.bf16.mxu1 %v1335_v26 }
 0x11e   :  { %v1173_v32 = vadd.f32 %v1172_v30, %v1171_v28  ;;  %v563_v28 = vpop.permute.xlu0 %562 }
 0x11f   :  { %v1174_v34 = vpop.f32.mrf.mxu0 }
 0x120   :  { %v575_v36 = vmul.f32 %v1173_v32, %v518_v33 }
 0x121   :  { %v1175_v37 = vpop.f32.mrf.mxu0 }
 0x122   :  { %v588_v39 = vpack.c.bf16 %v575_v36, %v574_v35  ;;  %v1176_v41 = vadd.f32 %v1175_v37, %v1174_v34  ;;  %v1586_v36 = vld [vmem:[%s1615_s5] ss:$0 sm:$0xff]  ;;  %s1433_s5 = smov [#allocation9]  }
 0x123   :  { %v1177_v40 = vpop.f32.mrf.mxu0  ;;  %s991_s25 = sshll.u32 %s1433_s5, 4  ;;  %s992_s25 = int_to_ptr.vmem [resolvable:$true] %s991_s25 }
 0x124   :  { %842 = vmatmul.mubr.bf16.gmra.mxu1 %v588_v39  ;;  %v576_v47 = vmul.f32 %v1176_v41, %v523_v43  ;;  %s1401_s28 = scalar_lea.vmem %s992_s25, 1024  ;;  %p1406_p2 = scmp.lt.s32.totalorder %s992_s25, %s992_s25 }
 0x125   :  { %v1178_v42 = vpop.f32.mrf.mxu0  ;;  %849 = vmatprep.mubr.bf16.mxu1 %v1336_v38  ;;  %p1402_p1 = scmp.ne.s32.totalorder %s992_s25, %s1401_s28  ;;  %p1407_p3 = scmp.lt.s32.totalorder %s1401_s28, %s1401_s28 }
 0x126   :  { %v1179_v44 = vadd.f32 %v1178_v42, %v1177_v40 }
 0x127   :  { %v1180_v46 = vpop.f32.mrf.mxu0  ;;  %p1408_p4 = por %p1407_p3, %p1406_p2 }
 0x128   :  { %v577_v48 = vmul.f32 %v1179_v44, %v528_v45 }
 0x129   :  { %v1181_v49 = vpop.f32.mrf.mxu0  ;;  %p1409_p5 = pnand %p1408_p4, %p1402_p1 }
 0x12a   :  { %v589_v51 = vpack.c.bf16 %v577_v48, %v576_v47  ;;  %v1182_v53 = vadd.f32 %v1181_v49, %v1180_v46 }
 0x12b   :  { %v1183_v52 = vpop.f32.mrf.mxu0 }
 0x12c   :  { %850 = vmatmul.mubr.bf16.gmra.mxu1 %v589_v51  ;;  %v578_v59 = vmul.f32 %v1182_v53, %v533_v55 }
 0x12d   :  { %v1184_v54 = vpop.f32.mrf.mxu0  ;;  %857 = vmatprep.mubr.bf16.mxu1 %v1337_v50 }
 0x12e   :  { %v1185_v56 = vadd.f32 %v1184_v54, %v1183_v52 }
 0x12f   :  { %v1186_v58 = vpop.f32.mrf.mxu0 }
 0x130   :  { %v579_v60 = vmul.f32 %v1185_v56, %v538_v57 }
 0x131   :  { %v1187_v61 = vpop.f32.mrf.mxu0 }
 0x132   :  { %v590_v63 = vpack.c.bf16 %v579_v60, %v578_v59  ;;  %v1188_v1 = vadd.f32 %v1187_v61, %v1186_v58 }
 0x133   :  { %v1189_v0 = vpop.f32.mrf.mxu0 }
 0x134   :  { %858 = vmatmul.mubr.bf16.gmra.mxu1 %v590_v63  ;;  %v580_v7 = vmul.f32 %v1188_v1, %v543_v3 }
 0x135   :  { %v1190_v2 = vpop.f32.mrf.mxu0  ;;  %865 = vmatprep.mubr.bf16.mxu1 %v1338_v62 }
 0x136   :  { %v1191_v4 = vadd.f32 %v1190_v2, %v1189_v0 }
 0x137   :  { %v1192_v6 = vpop.f32.mrf.mxu0 }
 0x138   :  { %v581_v8 = vmul.f32 %v1191_v4, %v548_v5 }
 0x139   :  { %v1193_v9 = vpop.f32.mrf.mxu0 }
 0x13a   :  { %v591_v11 = vpack.c.bf16 %v581_v8, %v580_v7  ;;  %v1194_v13 = vadd.f32 %v1193_v9, %v1192_v6 }
 0x13b   :  { %v1195_v12 = vpop.f32.mrf.mxu0 }
 0x13c   :  { %866 = vmatmul.mubr.bf16.gmra.mxu1 %v591_v11  ;;  %v582_v19 = vmul.f32 %v1194_v13, %v553_v15 }
 0x13d   :  { %v1196_v14 = vpop.f32.mrf.mxu0  ;;  %873 = vmatprep.mubr.bf16.mxu1 %v1339_v10 }
 0x13e   :  { %v1197_v16 = vadd.f32 %v1196_v14, %v1195_v12 }
 0x13f   :  { %v1198_v18 = vpop.f32.mrf.mxu0 }
 0x140   :  { %v583_v20 = vmul.f32 %v1197_v16, %v558_v17 }
 0x141   :  { %v1199_v21 = vpop.f32.mrf.mxu0 }
 0x142   :  { %v592_v23 = vpack.c.bf16 %v583_v20, %v582_v19  ;;  %v1200_v25 = vadd.f32 %v1199_v21, %v1198_v18 }
 0x143   :  { %v1201_v24 = vpop.f32.mrf.mxu0 }
 0x144   :  { %874 = vmatmul.mubr.bf16.gmra.mxu1 %v592_v23  ;;  %v584_v30 = vmul.f32 %v1200_v25, %v563_v28 }
 0x145   :  { %v1202_v26 = vpop.f32.mrf.mxu0  ;;  %881 = vmatprep.mubr.bf16.mxu1 %v1340_v22 }
 0x146   :  { %v1203_v27 = vadd.f32 %v1202_v26, %v1201_v24 }
 0x148   :  { %v585_v31 = vmul.f32 %v1203_v27, %v568_v29 }
 0x14a   :  { %v593_v32 = vpack.c.bf16 %v585_v31, %v584_v30 }
 0x14c   :  { %882 = vmatmul.mubr.bf16.gmra.mxu1 %v593_v32 }
 0x1d4   :  { %v1220_v33 = vpop.f32.mrf.mxu1 }
 0x1d6   :  { %v1221_v34 = vpop.f32.mrf.mxu1 }
 0x1d7   :  { %v1222_v35 = vadd.f32 %v1221_v34, %v1220_v33 }
 0x1d8   :  { %v1223_v37 = vpop.f32.mrf.mxu1 }
 0x1d9   :  { %v828_v39 = vadd.f32 %v1222_v35, %v1586_v36 }
 0x1da   :  { %v1224_v38 = vpop.f32.mrf.mxu1 }
 0x1db   :  { %v1225_v40 = vadd.f32 %v1224_v38, %v1223_v37  ;;  %v890_v44 = vmax.f32 %v828_v39, 0.0 }
 0x1dc   :  { %v1226_v41 = vpop.f32.mrf.mxu1 }
 0x1dd   :  { %v831_v42 = vadd.f32 %v1225_v40, %v1586_v36 }
 0x1de   :  { %v1227_v43 = vpop.f32.mrf.mxu1 }
 0x1df   :  { %v891_v45 = vmax.f32 %v831_v42, 0.0  ;;  %v1228_v46 = vadd.f32 %v1227_v43, %v1226_v41 }
 0x1e0   :  { %v1229_v47 = vpop.f32.mrf.mxu1 }
 0x1e1   :  { %v1096_v48 = vpack.c.bf16 %v891_v45, %v890_v44  ;;  %v836_v50 = vadd.f32 %v1228_v46, %v1586_v36 }
 0x1e2   :  { %v1230_v49 = vpop.f32.mrf.mxu1 }
 0x1e3   :  { %1097 = vst [vmem:[#allocation9] sm:$0xff] %v1096_v48   ;;  %v1231_v51 = vadd.f32 %v1230_v49, %v1229_v47  ;;  %v892_v55 = vmax.f32 %v836_v50, 0.0 }
 0x1e4   :  { %v1232_v52 = vpop.f32.mrf.mxu1 }
 0x1e5   :  { %v839_v53 = vadd.f32 %v1231_v51, %v1586_v36 }
 0x1e6   :  { %v1233_v54 = vpop.f32.mrf.mxu1 }
 0x1e7   :  { %v893_v56 = vmax.f32 %v839_v53, 0.0  ;;  %v1234_v57 = vadd.f32 %v1233_v54, %v1232_v52 }
 0x1e8   :  { %v1235_v58 = vpop.f32.mrf.mxu1 }
 0x1e9   :  { %v1101_v59 = vpack.c.bf16 %v893_v56, %v892_v55  ;;  %v844_v61 = vadd.f32 %v1234_v57, %v1586_v36 }
 0x1ea   :  { %v1236_v60 = vpop.f32.mrf.mxu1 }
 0x1eb   :  { %1133 = vst [vmem:[#allocation9 + $0x8] sm:$0xff] %v1101_v59   ;;  %v1237_v62 = vadd.f32 %v1236_v60, %v1235_v58  ;;  %v894_v2 = vmax.f32 %v844_v61, 0.0 }
 0x1ec   :  { %v1238_v63 = vpop.f32.mrf.mxu1 }
 0x1ed   :  { %v847_v0 = vadd.f32 %v1237_v62, %v1586_v36 }
 0x1ee   :  { %v1239_v1 = vpop.f32.mrf.mxu1 }
 0x1ef   :  { %v895_v3 = vmax.f32 %v847_v0, 0.0  ;;  %v1240_v4 = vadd.f32 %v1239_v1, %v1238_v63 }
 0x1f0   :  { %v1241_v5 = vpop.f32.mrf.mxu1 }
 0x1f1   :  { %v1106_v6 = vpack.c.bf16 %v895_v3, %v894_v2  ;;  %v852_v8 = vadd.f32 %v1240_v4, %v1586_v36 }
 0x1f2   :  { %v1242_v7 = vpop.f32.mrf.mxu1 }
 0x1f3   :  { %1134 = vst [vmem:[#allocation9 + $0x10] sm:$0xff] %v1106_v6   ;;  %v1243_v9 = vadd.f32 %v1242_v7, %v1241_v5  ;;  %v896_v13 = vmax.f32 %v852_v8, 0.0 }
 0x1f4   :  { %v1244_v10 = vpop.f32.mrf.mxu1 }
 0x1f5   :  { %v855_v11 = vadd.f32 %v1243_v9, %v1586_v36 }
 0x1f6   :  { %v1245_v12 = vpop.f32.mrf.mxu1 }
 0x1f7   :  { %v897_v14 = vmax.f32 %v855_v11, 0.0  ;;  %v1246_v15 = vadd.f32 %v1245_v12, %v1244_v10 }
 0x1f8   :  { %v1247_v16 = vpop.f32.mrf.mxu1 }
 0x1f9   :  { %v1111_v17 = vpack.c.bf16 %v897_v14, %v896_v13  ;;  %v860_v19 = vadd.f32 %v1246_v15, %v1586_v36 }
 0x1fa   :  { %v1248_v18 = vpop.f32.mrf.mxu1 }
 0x1fb   :  { %1135 = vst [vmem:[#allocation9 + $0x18] sm:$0xff] %v1111_v17   ;;  %v1249_v20 = vadd.f32 %v1248_v18, %v1247_v16  ;;  %v898_v24 = vmax.f32 %v860_v19, 0.0 }
 0x1fc   :  { %v1250_v21 = vpop.f32.mrf.mxu1 }
 0x1fd   :  { %v863_v22 = vadd.f32 %v1249_v20, %v1586_v36 }
 0x1fe   :  { %v1251_v23 = vpop.f32.mrf.mxu1 }
 0x1ff   :  { %v899_v25 = vmax.f32 %v863_v22, 0.0  ;;  %v1252_v26 = vadd.f32 %v1251_v23, %v1250_v21 }
 0x200   :  { %v1253_v27 = vpop.f32.mrf.mxu1 }
 0x201   :  { %v1116_v28 = vpack.c.bf16 %v899_v25, %v898_v24  ;;  %v868_v30 = vadd.f32 %v1252_v26, %v1586_v36 }
 0x202   :  { %v1254_v29 = vpop.f32.mrf.mxu1 }
 0x203   :  { %1136 = vst [vmem:[#allocation9 + $0x20] sm:$0xff] %v1116_v28   ;;  %v1255_v31 = vadd.f32 %v1254_v29, %v1253_v27  ;;  %v900_v35 = vmax.f32 %v868_v30, 0.0 }
 0x204   :  { %v1256_v32 = vpop.f32.mrf.mxu1 }
 0x205   :  { %v871_v33 = vadd.f32 %v1255_v31, %v1586_v36 }
 0x206   :  { %v1257_v34 = vpop.f32.mrf.mxu1 }
 0x207   :  { %v901_v37 = vmax.f32 %v871_v33, 0.0  ;;  %v1258_v38 = vadd.f32 %v1257_v34, %v1256_v32 }
 0x208   :  { %v1259_v39 = vpop.f32.mrf.mxu1 }
 0x209   :  { %v1121_v40 = vpack.c.bf16 %v901_v37, %v900_v35  ;;  %v876_v42 = vadd.f32 %v1258_v38, %v1586_v36 }
 0x20a   :  { %v1260_v41 = vpop.f32.mrf.mxu1 }
 0x20b   :  { %1137 = vst [vmem:[#allocation9 + $0x28] sm:$0xff] %v1121_v40   ;;  %v1261_v43 = vadd.f32 %v1260_v41, %v1259_v39  ;;  %v902_v47 = vmax.f32 %v876_v42, 0.0 }
 0x20c   :  { %v1262_v44 = vpop.f32.mrf.mxu1 }
 0x20d   :  { %v879_v45 = vadd.f32 %v1261_v43, %v1586_v36 }
 0x20e   :  { %v1263_v46 = vpop.f32.mrf.mxu1 }
 0x20f   :  { %v903_v48 = vmax.f32 %v879_v45, 0.0  ;;  %v1264_v49 = vadd.f32 %v1263_v46, %v1262_v44 }
 0x210   :  { %v1265_v50 = vpop.f32.mrf.mxu1 }
 0x211   :  { %v1126_v51 = vpack.c.bf16 %v903_v48, %v902_v47  ;;  %v884_v53 = vadd.f32 %v1264_v49, %v1586_v36 }
 0x212   :  { %v1266_v52 = vpop.f32.mrf.mxu1 }
 0x213   :  { %1138 = vst [vmem:[#allocation9 + $0x30] sm:$0xff] %v1126_v51   ;;  %v1267_v54 = vadd.f32 %v1266_v52, %v1265_v50  ;;  %v904_v56 = vmax.f32 %v884_v53, 0.0 }
 0x215   :  { %v887_v55 = vadd.f32 %v1267_v54, %v1586_v36 }
 0x217   :  { %v905_v57 = vmax.f32 %v887_v55, 0.0 }
 0x219   :  { %v1131_v58 = vpack.c.bf16 %v905_v57, %v904_v56 }
 0x21b   :  { %1139 = vst [vmem:[#allocation9 + $0x38] sm:$0xff] %v1131_v58  }
 0x21c   :  { %1412 = shalt.err (!%p1409_p5)
}
 0x21d   :  { %997 = dma.vmem_to_hbm [thread:$0]  %s992_s25, 1024, %s1616_s6, [#allocation5], %s1429_s26, %s1429_s26, %s1430_s27  }
 0x21e   :  { %1425 = dma.done.wait [#allocation5], 1024  }
 0x21f   :  { %1426 = vsyncadd [#allocation5], 4294966272 }
 0x220   :  { %1001 = vsyncpa [#allocation4], 1 }
 0x221   :  { %1002 = vsyncpa [#allocation7], 1 }
 0x222   :  { %1003 = vsyncpa [#allocation5], 1 }

</bundles_post_ra>
